<compile_context>
chip_gen: v7x
topology: tpu7x:2x2x1
jax: 0.10.0
libtpu: 0.0.40
codegen_flags: <defaults>
</compile_context>

<pallas_src>
import jax
import jax.numpy as jnp
from jax import lax
from jax.experimental import pallas as pl
from jax.experimental.pallas import tpu as pltpu


# ------------------------------------------------------------------------------ kernel --
def ffn_kernel(x_ref, w1p_ref, w2p_ref, out_ref):
    """One batch tile.

    x_ref   : (Bt, C)      raw context rows
    w1p_ref : (C+1, H0)    [W1^T ; b1]            (bias packed as last row)
    w2p_ref : (H0+1, 3P)   [W2^T @ Wargs ; b2a]   (args_proj fused, bias packed)
    out_ref : (Bt, 3P+1)   [df | loc | sd | scale] lane-contiguous slab
    """
    x = x_ref[...]                                                   # (Bt, C) f32
    P3 = w2p_ref.shape[1]                                            # 3 * prediction_length
    P = P3 // 3

    # mean_abs_scaling (min_scale = 1e-5); exact divide (negligible cost, tight numerics).
    scale = jnp.maximum(jnp.mean(jnp.abs(x), axis=1, keepdims=True), 1e-5)   # (Bt, 1)
    xs = x / scale

    # Linear(C, H0) + ReLU with the bias folded into the MXU: [xs | 1] @ [W1^T ; b1].
    # The MXU K dimension pads to 128 anyway (C = 32), so the extra column is free.
    ones = jnp.ones((x.shape[0], 1), jnp.float32)
    h = jnp.dot(jnp.concatenate([xs, ones], axis=1), w1p_ref[...],
                preferred_element_type=jnp.float32)
    h = jnp.maximum(h, 0.0)                                          # (Bt, H0)

    # Fused [Linear(H0, P*H1) -> args_proj], bias folded the same way: [h | 1] @ [W2a ; b2a].
    args = jnp.dot(jnp.concatenate([h, ones], axis=1), w2p_ref[...],
                   preferred_element_type=jnp.float32)               # (Bt, 3P)

    # StudentTOutput.domain_map applied column-block-wise (no lane slicing / re-concat):
    #   cols [0,P): df = 2 + softplus ; [P,2P): loc = identity ; [2P,3P): sd = softplus.
    col = lax.broadcasted_iota(jnp.int32, args.shape, 1)
    sp = jnp.logaddexp(args, 0.0)                                    # softplus on EUP
    mapped = jnp.where(col < P, 2.0 + sp, jnp.where(col < 2 * P, args, sp))

    # Single merged store: one output DMA per grid step, [df | loc | sd | scale].
    out_ref[...] = jnp.concatenate([mapped, scale], axis=1)


# --------------------------------------------------------------------- one-time packing --
def pack_params(params, prediction_length, hidden_dimensions):
    """Run ONCE per parameter set (outside the per-call path)."""
    H1 = hidden_dimensions[-1]
    P = prediction_length

    w1, b1 = params["w1"], params["b1"]              # (H0, C), (H0,)       torch Linear layout
    w2, b2 = params["w2"], params["b2"]              # (P*H1, H0), (P*H1,)
    w_df, b_df = params["w_df"], params["b_df"]      # (1, H1), (1,)
    w_loc, b_loc = params["w_loc"], params["b_loc"]
    w_sc, b_sc = params["w_sc"], params["b_sc"]

    # args_proj on the reshaped (B, P, H1) output == block-diagonal (P*H1, 3P) matrix on
    # the flat (B, P*H1) output.
    eye_p = jnp.eye(P, dtype=jnp.float32)
    wa = jnp.concatenate(
        [jnp.kron(eye_p, w_df.T), jnp.kron(eye_p, w_loc.T), jnp.kron(eye_p, w_sc.T)],
        axis=1)                                      # (P*H1, 3P)
    ba = jnp.concatenate(
        [jnp.full((P,), b_df[0], jnp.float32),
         jnp.full((P,), b_loc[0], jnp.float32),
         jnp.full((P,), b_sc[0], jnp.float32)])      # (3P,)

    # No nonlinearity between Linear(H0, P*H1) and args_proj -> fuse them algebraically.
    w2a = w2.T @ wa                                  # (H0, 3P)
    b2a = b2 @ wa + ba                               # (3P,)

    # Pack each bias as an extra trailing row; the kernel folds it into the dot via a
    # ones column on the activations.
    w1p = jnp.concatenate([w1.T, b1[None, :]], axis=0)    # (C+1, H0)
    w2p = jnp.concatenate([w2a, b2a[None, :]], axis=0)    # (H0+1, 3P)
    return w1p, w2p


# ------------------------------------------------------------------------------ wrapper --
_MAX_BLOCK_B = 8192     # 8192*(32 in + 25 out)*4 B * 2 double-buffers ~= 3.8 MiB of VMEM:
                        # comfortably inside v7x's 32 MiB scoped / 64 MiB physical budget
                        # (and trivially inside v5e/v6e's 128 MiB).
_MIN_GRID_BLOCKS = 4    # keep >= 4 blocks so v7x's two TensorCores split + load-balance.


def _pick_batch_block(B):
    if B <= 8 * _MIN_GRID_BLOCKS:
        return B                                    # tiny batch: launch/DMA-latency bound
    block = min(_MAX_BLOCK_B, pl.cdiv(B, _MIN_GRID_BLOCKS))
    block = ((block + 7) // 8) * 8                  # sublane multiple
    return min(block, B)


def _forward_impl(context, w1p, w2p):
    B, C = context.shape
    P3 = w2p.shape[1]
    P = P3 // 3
    block_b = _pick_batch_block(B)
    grid = (pl.cdiv(B, block_b),)   # ragged final block is fine: rows are independent and
                                    # Pallas masks out-of-bounds writes.

    out = pl.pallas_call(
        ffn_kernel,
        out_shape=jax.ShapeDtypeStruct((B, P3 + 1), jnp.float32),   # [df | loc | sd | scale]
        grid_spec=pltpu.PrefetchScalarGridSpec(
            num_scalar_prefetch=0,
            grid=grid,
            in_specs=[
                pl.BlockSpec((block_b, C), lambda i: (i, 0)),
                pl.BlockSpec(w1p.shape, lambda i: (0, 0)),    # resident: DMA'd once
                pl.BlockSpec(w2p.shape, lambda i: (0, 0)),    # resident: DMA'd once
            ],
            out_specs=pl.BlockSpec((block_b, P3 + 1), lambda i: (i, 0)),
        ),
        compiler_params=pltpu.CompilerParams(dimension_semantics=("parallel",)),
    )(context, w1p, w2p)

    df = out[:, 0:P]
    loc = out[:, P:2 * P]
    sd = out[:, 2 * P:3 * P]
    scale = out[:, 3 * P:3 * P + 1]
    return (df, loc, sd), jnp.zeros_like(scale), scale


# Single jit around the whole per-call path: pallas_call + output slicing fuse; no
# per-call weight massaging remains.
feedforward_network_forward = jax.jit(_forward_impl)


# ---------------------------------------------------------------------------- reference --
def _reference_forward(context, params, P, hidden_dimensions):
    """Pure-JAX reference mirroring the PyTorch graph (un-fused reshape path)."""
    H1 = hidden_dimensions[-1]
    scale = jnp.maximum(jnp.mean(jnp.abs(context), axis=1, keepdims=True), 1e-5)
    x = context / scale
    h = jnp.maximum(x @ params["w1"].T + params["b1"], 0.0)
    nn_out = h @ params["w2"].T + params["b2"]
    r = nn_out.reshape(-1, P, H1)
    df = 2.0 + jnp.logaddexp(r @ params["w_df"].T + params["b_df"], 0.0)[..., 0]
    loc = (r @ params["w_loc"].T + params["b_loc"])[..., 0]
    sd = jnp.logaddexp(r @ params["w_sc"].T + params["b_sc"], 0.0)[..., 0]
    return (df, loc, sd), jnp.zeros_like(scale), scale


def init_params(key, context_length, prediction_length, hidden_dimensions):
    H0 = hidden_dimensions[0]
    H1 = hidden_dimensions[-1]
    P = prediction_length
    ks = jax.random.split(key, 8)
    u = lambda k, shape: jax.random.uniform(k, shape, jnp.float32, -0.07, 0.07)
    return {
        # nn.Sequential Linears: uniform(-0.07, 0.07) weights, zero biases (per __make_lin)
        "w1": u(ks[0], (H0, context_length)), "b1": jnp.zeros((H0,), jnp.float32),
        "w2": u(ks[1], (P * H1, H0)),         "b2": jnp.zeros((P * H1,), jnp.float32),
        # args_proj Linears (deterministic synthetic init)
        "w_df": u(ks[2], (1, H1)),  "b_df": u(ks[3], (1,)),
        "w_loc": u(ks[4], (1, H1)), "b_loc": u(ks[5], (1,)),
        "w_sc": u(ks[6], (1, H1)),  "b_sc": u(ks[7], (1,)),
    }


if __name__ == "__main__":
    context_length = 32
    prediction_length = 8
    hidden_dimensions = (32, 16)

    key = jax.random.PRNGKey(0)
    kx, kp, kx2 = jax.random.split(key, 3)
    params = init_params(kp, context_length, prediction_length, hidden_dimensions)

    # One-time weight packing (transpose + args-proj fusion + bias packing), hoisted out
    # of the per-call path.
    w1p, w2p = pack_params(params, prediction_length, hidden_dimensions)

    def check(context):
        (df, loc, sd), zeros, scale = jax.block_until_ready(
            feedforward_network_forward(context, w1p, w2p))
        (rdf, rloc, rsd), _, rscale = _reference_forward(
            context, params, prediction_length, hidden_dimensions)
        # fused args-proj accumulation order differs from the reference -> compare at 1e-3.
        assert jnp.allclose(df, rdf, atol=1e-3, rtol=1e-3)
        assert jnp.allclose(loc, rloc, atol=1e-3, rtol=1e-3)
        assert jnp.allclose(sd, rsd, atol=1e-3, rtol=1e-3)
        assert jnp.allclose(scale, rscale, atol=1e-6, rtol=1e-6)
        assert jnp.all(zeros == 0.0)

    # Small demo batch (single block).
    ctx_small = jax.random.normal(kx, (8, context_length), jnp.float32) * 3.0 + 1.0
    check(ctx_small)

    # Multi-block path with a ragged final block: grid = cdiv(100, 32) = 4, last block has
    # only 4 valid rows -> exercises the new cdiv tiling policy.
    ctx_big = jax.random.normal(kx2, (100, context_length), jnp.float32) * 3.0 + 1.0
    check(ctx_big)

    print("KERNEL_OK")
</pallas_src>

<mosaic_0001>
module attributes {stable_mosaic.version = 11 : i64} {
  func.func @ffn_kernel(%arg0: i32, %arg1: memref<8x32xf32, #tpu.memory_space<vmem>>, %arg2: memref<33x32xf32, #tpu.memory_space<vmem>>, %arg3: memref<33x24xf32, #tpu.memory_space<vmem>>, %arg4: memref<8x25xf32, #tpu.memory_space<vmem>>) attributes {dimension_semantics = [#tpu.dimension_semantics<parallel>], iteration_bounds = array<i64: 1>, scalar_prefetch = 0 : i64, scratch_operands = 0 : i64, tpu.core_type = #tpu.core_type<tc>, window_params = [{transform_indices = @transform_0, window_bounds = array<i64: 8, 32>}, {pipeline_mode = #tpu.pipeline_mode<synchronous>, transform_indices = @transform_1, window_bounds = array<i64: 33, 32>}, {pipeline_mode = #tpu.pipeline_mode<synchronous>, transform_indices = @transform_2, window_bounds = array<i64: 33, 24>}, {transform_indices = @transform_3, window_bounds = array<i64: 8, 25>}]} {
    %c0 = arith.constant 0 : index
    %c0_0 = arith.constant 0 : index
    %0 = vector.load %arg1[%c0, %c0_0] : memref<8x32xf32, #tpu.memory_space<vmem>>, vector<8x32xf32>
    %1 = math.absf %0 : vector<8x32xf32>
    %cst = arith.constant dense<0.000000e+00> : vector<8xf32>
    %2 = vector.multi_reduction <add>, %1, %cst [1] : vector<8x32xf32> to vector<8xf32>
    %3 = vector.shape_cast %2 : vector<8xf32> to vector<8x1xf32>
    %cst_1 = arith.constant 3.200000e+01 : f32
    %4 = vector.broadcast %cst_1 : f32 to vector<8x1xf32>
    %5 = arith.divf %3, %4 : vector<8x1xf32>
    %cst_2 = arith.constant 9.99999974E-6 : f32
    %6 = vector.broadcast %cst_2 : f32 to vector<8x1xf32>
    %7 = arith.maximumf %5, %6 : vector<8x1xf32>
    %8 = vector.broadcast %7 : vector<8x1xf32> to vector<8x32xf32>
    %9 = arith.divf %0, %8 : vector<8x32xf32>
    %cst_3 = arith.constant 1.000000e+00 : f32
    %10 = vector.broadcast %cst_3 : f32 to vector<8x1xf32>
    %11 = tpu.concatenate %9, %10 in 1 : vector<8x32xf32>, vector<8x1xf32> -> vector<8x33xf32>
    %c0_4 = arith.constant 0 : index
    %c0_5 = arith.constant 0 : index
    %12 = vector.load %arg2[%c0_4, %c0_5] : memref<33x32xf32, #tpu.memory_space<vmem>>, vector<33x32xf32>
    %cst_6 = arith.constant dense<0.000000e+00> : vector<8x32xf32>
    %13 = tpu.matmul %11, %12, %cst_6 {dimension_numbers = #tpu.dot_dimension_numbers<[1], [0], [0], [1], [0, 0, 1, 1], [], []>} : vector<8x33xf32>, vector<33x32xf32>, vector<8x32xf32> -> vector<8x32xf32>
    %cst_7 = arith.constant 0.000000e+00 : f32
    %14 = vector.broadcast %cst_7 : f32 to vector<8x32xf32>
    %15 = arith.maximumf %13, %14 : vector<8x32xf32>
    %16 = tpu.concatenate %15, %10 in 1 : vector<8x32xf32>, vector<8x1xf32> -> vector<8x33xf32>
    %c0_8 = arith.constant 0 : index
    %c0_9 = arith.constant 0 : index
    %17 = vector.load %arg3[%c0_8, %c0_9] : memref<33x24xf32, #tpu.memory_space<vmem>>, vector<33x24xf32>
    %cst_10 = arith.constant dense<0.000000e+00> : vector<8x24xf32>
    %18 = tpu.matmul %16, %17, %cst_10 {dimension_numbers = #tpu.dot_dimension_numbers<[1], [0], [0], [1], [0, 0, 1, 1], [], []>} : vector<8x33xf32>, vector<33x24xf32>, vector<8x24xf32> -> vector<8x24xf32>
    %19 = tpu.iota {dimensions = array<i32: 1>} : vector<8x24xi32>
    %cst_11 = arith.constant 0.000000e+00 : f32
    %20 = vector.broadcast %cst_11 : f32 to vector<8x24xf32>
    %21 = arith.maximumf %18, %20 : vector<8x24xf32>
    %22 = vector.broadcast %cst_11 : f32 to vector<8x24xf32>
    %23 = arith.subf %18, %22 : vector<8x24xf32>
    %24 = arith.cmpf one, %23, %23 : vector<8x24xf32>
    %25 = vector.broadcast %cst_11 : f32 to vector<8x24xf32>
    %26 = arith.addf %18, %25 : vector<8x24xf32>
    %27 = math.absf %23 : vector<8x24xf32>
    %cst_12 = arith.constant 0.000000e+00 : f32
    %28 = vector.broadcast %cst_12 : f32 to vector<8x24xf32>
    %29 = arith.subf %28, %27 : vector<8x24xf32>
    %30 = math.exp %29 : vector<8x24xf32>
    %31 = math.log1p %30 : vector<8x24xf32>
    %32 = arith.addf %21, %31 : vector<8x24xf32>
    %33 = arith.select %24, %26, %32 : vector<8x24xi1>, vector<8x24xf32>
    %c8_i32 = arith.constant 8 : i32
    %34 = vector.broadcast %c8_i32 : i32 to vector<8x24xi32>
    %35 = arith.cmpi slt, %19, %34 : vector<8x24xi32>
    %cst_13 = arith.constant 2.000000e+00 : f32
    %36 = vector.broadcast %cst_13 : f32 to vector<8x24xf32>
    %37 = arith.addf %36, %33 : vector<8x24xf32>
    %c16_i32 = arith.constant 16 : i32
    %38 = vector.broadcast %c16_i32 : i32 to vector<8x24xi32>
    %39 = arith.cmpi slt, %19, %38 : vector<8x24xi32>
    %40 = arith.select %39, %18, %33 : vector<8x24xi1>, vector<8x24xf32>
    %41 = arith.select %35, %37, %40 : vector<8x24xi1>, vector<8x24xf32>
    %42 = tpu.concatenate %41, %7 in 1 : vector<8x24xf32>, vector<8x1xf32> -> vector<8x25xf32>
    %c0_14 = arith.constant 0 : index
    %c0_15 = arith.constant 0 : index
    %43 = vector.load %arg4[%c0_14, %c0_15] : memref<8x25xf32, #tpu.memory_space<vmem>>, vector<8x25xf32>
    tpu.vector_store %arg4[%c0_14, %c0_15], %42 {strides = array<i32>} : memref<8x25xf32, #tpu.memory_space<vmem>>, vector<8x25xf32>,
    return
  }
  func.func @transform_0(%arg0: i32) -> (i32, i32) {
    %c0_i32 = arith.constant 0 : i32
    %c0_i32_0 = arith.constant 0 : i32
    return %arg0, %c0_i32 : i32, i32
  }
  func.func @transform_1(%arg0: i32) -> (i32, i32) {
    %c0_i32 = arith.constant 0 : i32
    %c0_i32_0 = arith.constant 0 : i32
    %c0_i32_1 = arith.constant 0 : i32
    return %c0_i32, %c0_i32_0 : i32, i32
  }
  func.func @transform_2(%arg0: i32) -> (i32, i32) {
    %c0_i32 = arith.constant 0 : i32
    %c0_i32_0 = arith.constant 0 : i32
    %c0_i32_1 = arith.constant 0 : i32
    return %c0_i32, %c0_i32_0 : i32, i32
  }
  func.func @transform_3(%arg0: i32) -> (i32, i32) {
    %c0_i32 = arith.constant 0 : i32
    %c0_i32_0 = arith.constant 0 : i32
    return %arg0, %c0_i32 : i32, i32
  }
}

</mosaic_0001>

<bundles_post_ra>
// kernel: _forward_impl.1
= control target key start
LH: loop header
LB: loop body
LE: loop exit
PB: predicated region body
PF: predicated region fallthrough
CT: control target
= control target key end

     0   :  { %vm16_vm0 = vcmask 261120   ;;  %v288_v3 = vmov 0.0|0.0   ;;  %vm289_vm1 = vmmov 0   ;;  %v290_v7 = vmov 0.0   ;;  %s352_s0 = inlined_call_operand.vmem [shape: f32[8,32], index: 0, kind: input, shape index: {}]   ;;  %s353_s1 = inlined_call_operand.vmem [shape: f32[33,32], index: 1, kind: input, shape index: {}]   ;;  %s354_s2 = inlined_call_operand.vmem [shape: f32[33,24], index: 2, kind: input, shape index: {}]   ;;  %s355_s3 = inlined_call_operand.vmem [shape: f32[8,25], index: 3, kind: output, shape index: {}]  }
   0x1   :  { %v14_v0 = vld [vmem:[%s352_s0] sm:$0xff]  ;;  %267 = vmatprep.subr.bf16.mxu0 %v288_v3  ;;  %v27_v5 = vld [vmem:[%s353_s1 + $0x8] sm:$0xff]  ;;  %v28_v6 = vld [vmem:[%s353_s1 + $0x10] sm:$0xff]  ;;  %251 = vmatprep.mubr.msk.f32.mxu0 %vm289_vm1, %v290_v7  ;;  %vm35_vm2 = vcmask 1040384   ;;  %vm31_vm3 = vcmask 269312   ;;  %v192_v37 = vlaneseq  ;;  %vm217_vm8 = vcmask 195584  }
   0x2   :  { %v15_v1 = vand.u32 2147483647, %v14_v0  ;;  %v26_v4 = vld [vmem:[%s353_s1] sm:$0xff]  ;;  %v29_v9 = vld [vmem:[%s353_s1 + $0x18] sm:$0xff]  ;;  %273 = vmatprep.subr.bf16.mxu1 %v288_v3  ;;  %264 = vmatprep.mubr.msk.f32.mxu1 %vm289_vm1, %v290_v7  ;;  %v112_v13 = vld [vmem:[%s354_s2 + $0x8] sm:$0xff]  ;;  %vm219_vm9 = vcmask 203776  }
   0x3   :  { %v268_v8 = vpack.c.bf16 %v27_v5, %v26_v4  ;;  %v271_v10 = vpack.c.bf16 %v29_v9, %v28_v6  ;;  %v30_v11 = vld [vmem:[%s353_s1 + $0x20] sm:$0x1]  ;;  %v113_v14 = vld [vmem:[%s354_s2 + $0x10] sm:$0xff]  ;;  %v114_v16 = vld [vmem:[%s354_s2 + $0x18] sm:$0xff]  ;;  %v193_v41 = vand.u32 127, %v192_v37 }
   0x4   :  { %v17_v2 = vsel %vm16_vm0, %v15_v1, 0.0  ;;  %v111_v12 = vld [vmem:[%s354_s2] sm:$0xff]  ;;  %v277_v17 = vpack.c.bf16 %v114_v16, %v113_v14 }
   0x5   :  { %18 = vadd.xlane.f32.xlu0 %v17_v2  ;;  %269 = vmatpush3.bf16.msra.mxu0 %v268_v8  ;;  %v274_v15 = vpack.c.bf16 %v112_v13, %v111_v12  ;;  %v115_v24 = vld [vmem:[%s354_s2 + $0x20] sm:$0x1]  ;;  %vm214_vm5 = vcmp.lt.s32.totalorder %v193_v41, 16  ;;  %vm212_vm7 = vcmp.lt.s32.totalorder %v193_v41, 8 }
   0x6   :  { %270 = vmatprep.subr.bf16.mxu0 %v288_v3 }
   0x7   :  { %275 = vmatpush3.bf16.msra.mxu1 %v274_v15 }
   0x8   :  { %276 = vmatprep.subr.bf16.mxu1 %v288_v3 }
   0x9   :  { %272 = vmatpush3.bf16.msra.mxu0 %v271_v10 }
   0xa   :  { %249 = vmatprep.subr.mxu0 %v290_v7 }
   0xb   :  { %278 = vmatpush3.bf16.msra.mxu1 %v277_v17 }
   0xc   :  { %262 = vmatprep.subr.mxu1 %v290_v7 }
   0xd   :  { %250 = vmatpush3.msk.msra.mxu0 %vm35_vm2, %v30_v11 }
   0xf   :  { %263 = vmatpush3.msk.msra.mxu1 %vm35_vm2, %v115_v24 }
  0x92   :  { %v19_v18 = vpop.xlane.xlu0 %18 }
  0x93   :  { %v21_v19 = vmul.f32 0.03125, %v19_v18 }
  0x95   :  { %v22_v20 = vmax.f32 %v21_v19, 1e-05 }
  0x97   :  { %282 = vrcp.f32 %v22_v20 }
  0xa1   :  { %v283_v21 = vpop.eup %282 }
  0xa2   :  { %v24_v22 = vmul.f32 %v283_v21, %v14_v0 }
  0xa4   :  { %v25_v23 = vsel %vm16_vm0, %v24_v22, 1.0 }
  0xa5   :  { %252 = vmatmul.mubr.msk.f32.vlgmr.msra.gmra.mrb[0].mxu0 %vm31_vm3, %v25_v23 }
 0x178   :  { %v105_v25 = vpop.f32.mrb[0].mxu0 }
 0x179   :  { %v109_v26 = vmax.f32 %v105_v25, 0.0  ;;  %v253_v27 = vpop.f32.mrb[1].mxu0 }
 0x17b   :  { %v110_v28 = vsel %vm16_vm0, %v109_v26, 1.0 }
 0x17c   :  { %265 = vmatmul.mubr.msk.f32.vlgmr.msra.gmra.mrb[0].mxu1 %vm31_vm3, %v110_v28 }
 0x24f   :  { %v188_v29 = vpop.f32.mrb[0].mxu1 }
 0x250   :  { %v197_v30 = vand.u32 2147483647, %v188_v29  ;;  %v266_v31 = vpop.f32.mrb[1].mxu1  ;;  %v194_v44 = vmax.f32 %v188_v29, 0.0  ;;  %vm195_vm6 = vcmp.ne.f32.partialorder %v188_v29, %v188_v29 }
 0x252   :  { %v198_v32 = vsub.f32 0.0, %v197_v30 }
 0x254   :  { %v199_v33 = vmul.f32 1.442695, %v198_v32 }
 0x256   :  { %284 = vpow2.f32 %v199_v33 }
 0x260   :  { %v285_v34 = vpop.eup %284 }
 0x261   :  { %v201_v35 = vadd.f32 1.0, %v285_v34  ;;  %v204_v36 = vmul.f32 -0.5, %v285_v34  ;;  %v207_v39 = vand.u32 2147483647, %v285_v34 }
 0x263   :  { %286 = vlog2.f32 %v201_v35  ;;  %v205_v38 = vadd.f32 1.0, %v204_v36  ;;  %vm208_vm4 = vcmp.lt.f32.partialorder %v207_v39, 0.0004427343 }
 0x265   :  { %v206_v43 = vmul.f32 %v285_v34, %v205_v38 }
 0x26d   :  { %v287_v40 = vpop.eup %286 }
 0x26e   :  { %v203_v42 = vmul.f32 0.6931472, %v287_v40 }
 0x270   :  { %v209_v45 = vsel %vm208_vm4, %v206_v43, %v203_v42 }
 0x271   :  { %v210_v46 = vadd.f32 %v209_v45, %v194_v44 }
 0x273   :  { %v211_v47 = vsel %vm195_vm6, %v188_v29, %v210_v46 }
 0x274   :  { %v213_v48 = vadd.f32 2.0, %v211_v47  ;;  %v215_v49 = vsel %vm214_vm5, %v188_v29, %v211_v47 }
 0x276   :  { %v216_v50 = vsel %vm212_vm7, %v213_v48, %v215_v49 }
 0x277   :  { %v218_v51 = vsel %vm217_vm8, %v216_v50, %v22_v20 }
 0x278   :  { %220 = vst.msk [vmem:[%s355_s3] sm:$0xff] %vm219_vm9, %v218_v51 }

</bundles_post_ra>
